<compile_context>
chip_gen: v7x
topology: tpu7x:2x2x1
jax: 0.10.0
libtpu: 0.0.40
codegen_flags: <defaults>
</compile_context>

<pallas_src>
import jax
import jax.numpy as jnp
from jax.experimental import pallas as pl
from jax.experimental.pallas import tpu as pltpu

_LANE = 128                       # lane-dense feature padding (256 tiles for production v6e/v7x)
_EPS = 1e-5
_VMEM_LIMIT = 32 * 1024 * 1024    # explicit scoped-VMEM budget, <= physical on v5e/v6e/v7x


def _round_up(x, m):
    return (x + m - 1) // m * m


def _vae_decoder_kernel(h_ref,
                        w1_ref, b1_ref, g1_ref, be1_ref,
                        w2_ref, b2_ref, g2_ref, be2_ref,
                        wc_ref, bc_ref,
                        o_ref):
    eps = jnp.float32(_EPS)
    inv_n = jnp.float32(1.0 / h_ref.shape[0])   # full (unpadded) batch

    def linear(x_bf16, w_ref, b_ref):
        # bf16 x bf16 MXU matmul with f32 accumulation.
        return jnp.dot(x_bf16, w_ref[...],
                       preferred_element_type=jnp.float32) + b_ref[...]

    def batchnorm(x, g_ref, be_ref):
        # Train-mode batch stats (biased variance), two-pass (centered) var,
        # affine folded into a single scale/shift FMA; rsqrt rides the EUP slot.
        # Padded feature columns have gamma = beta = 0 -> stay exactly 0.
        m = jnp.sum(x, axis=0, keepdims=True) * inv_n
        xc = x - m
        v = jnp.sum(xc * xc, axis=0, keepdims=True) * inv_n
        scale = g_ref[...] * jax.lax.rsqrt(v + eps)
        shift = be_ref[...] - m * scale
        return x * scale + shift

    # lin1 + ReLU -> bn1   (h arrives in bf16 with an UNPADDED contracting dim)
    x = jnp.maximum(linear(h_ref[...], w1_ref, b1_ref), 0.0)
    x = batchnorm(x, g1_ref, be1_ref)

    # lin2 + ReLU -> bn2
    x = jnp.maximum(linear(x.astype(jnp.bfloat16), w2_ref, b2_ref), 0.0)
    x = batchnorm(x, g2_ref, be2_ref)

    # clf -> lane-dense padded output (unmasked vst)
    o_ref[...] = linear(x.astype(jnp.bfloat16), wc_ref, bc_ref)


@jax.jit
def vae_decoder(h, padded_params):
    """h: (N, hidden) unpadded. Returns the lane-padded (N, op) output.

    The consumer slices `[:, :out_channels]` lazily; keeping the slice out of
    the jitted hot path avoids an extra full read/write of the output buffer.
    """
    n, hidden = h.shape
    hp = padded_params["w1"].shape[1]          # lane-padded hidden
    op = padded_params["wc"].shape[1]          # lane-padded out_channels

    operands = (
        h.astype(jnp.bfloat16),                # bf16 LHS: half the HBM/VMEM traffic
        padded_params["w1"], padded_params["b1"],
        padded_params["g1"], padded_params["be1"],
        padded_params["w2"], padded_params["b2"],
        padded_params["g2"], padded_params["be2"],
        padded_params["wc"], padded_params["bc"],
    )

    # Whole arrays VMEM-resident, single invocation (no grid): train-mode BN
    # needs full-batch statistics and every operand is tiny at these shapes.
    in_specs = [pl.BlockSpec(memory_space=pltpu.MemorySpace.VMEM)
                for _ in operands]
    out_spec = pl.BlockSpec(memory_space=pltpu.MemorySpace.VMEM)

    flops = 2 * n * (hidden * hp + hp * hp + hp * op) + 12 * n * hp
    bytes_accessed = (sum(int(x.size) * x.dtype.itemsize for x in operands)
                      + n * op * 4)
    cost = pl.CostEstimate(flops=flops,
                           transcendentals=2 * hp,        # two rsqrt rows
                           bytes_accessed=bytes_accessed)

    return pl.pallas_call(
        _vae_decoder_kernel,
        out_shape=jax.ShapeDtypeStruct((n, op), jnp.float32),
        in_specs=in_specs,
        out_specs=out_spec,
        compiler_params=pltpu.CompilerParams(vmem_limit_bytes=_VMEM_LIMIT),
        cost_estimate=cost,
    )(*operands)


def init_params(key, hidden, out_channels):
    """Deterministic synthetic parameters (PyTorch-Linear-like scale).

    Linear weights are stored as (in_features, out_features) == W_pt.T so the
    kernel computes x @ W + b directly on the MXU.
    """
    ks = jax.random.split(key, 6)
    s = float(1.0 / (hidden ** 0.5))
    return {
        "w1": jax.random.uniform(ks[0], (hidden, hidden), jnp.float32, -s, s),
        "b1": jax.random.uniform(ks[1], (1, hidden), jnp.float32, -s, s),
        "g1": jnp.ones((1, hidden), jnp.float32),       # bn1 weight
        "be1": jnp.zeros((1, hidden), jnp.float32),     # bn1 bias
        "w2": jax.random.uniform(ks[2], (hidden, hidden), jnp.float32, -s, s),
        "b2": jax.random.uniform(ks[3], (1, hidden), jnp.float32, -s, s),
        "g2": jnp.ones((1, hidden), jnp.float32),       # bn2 weight
        "be2": jnp.zeros((1, hidden), jnp.float32),     # bn2 bias
        "wc": jax.random.uniform(ks[4], (hidden, out_channels), jnp.float32, -s, s),
        "bc": jax.random.uniform(ks[5], (1, out_channels), jnp.float32, -s, s),
    }


def pad_params(params, lane=_LANE):
    """Zero-pad OUTPUT features to a lane multiple (once), cast weights to bf16.

    Layer-1's contracting (input-feature) dim is left unpadded so the raw h
    can be fed straight to the kernel.  Padded BN gamma/beta entries are zero
    so padded feature columns stay exactly 0 through the whole pipeline.
    """
    hidden = params["w1"].shape[0]
    out_channels = params["wc"].shape[1]
    hp = _round_up(hidden, lane)
    op = _round_up(out_channels, lane)
    dh = hp - hidden
    do = op - out_channels

    def pad_vec(v, extra):
        return jnp.pad(v, ((0, 0), (0, extra)))

    return {
        "w1": jnp.pad(params["w1"], ((0, 0), (0, dh))).astype(jnp.bfloat16),
        "b1": pad_vec(params["b1"], dh),
        "g1": pad_vec(params["g1"], dh),
        "be1": pad_vec(params["be1"], dh),
        "w2": jnp.pad(params["w2"], ((0, dh), (0, dh))).astype(jnp.bfloat16),
        "b2": pad_vec(params["b2"], dh),
        "g2": pad_vec(params["g2"], dh),
        "be2": pad_vec(params["be2"], dh),
        "wc": jnp.pad(params["wc"], ((0, dh), (0, do))).astype(jnp.bfloat16),
        "bc": pad_vec(params["bc"], do),
    }


def _reference(h, padded_params, out_channels, eps=_EPS):
    """Pure-JAX reference mirroring the kernel's numerics (bf16 matmuls with
    f32 accumulation, train-mode BN) = the PyTorch forward at bf16 matmul
    precision.  Documented deviation: exact PyTorch parity would need f32
    matmuls; at hidden=32 the bf16 error is well inside the 1e-2 tolerance."""
    p = padded_params

    def lin(x, w, b):
        return jnp.dot(x.astype(jnp.bfloat16), w,
                       preferred_element_type=jnp.float32) + b

    def bn(x, g, b):
        m = x.mean(0, keepdims=True)
        v = ((x - m) ** 2).mean(0, keepdims=True)
        return g * (x - m) * jax.lax.rsqrt(v + eps) + b

    x = jnp.maximum(lin(h, p["w1"], p["b1"]), 0.0)
    x = bn(x, p["g1"], p["be1"])
    x = jnp.maximum(lin(x, p["w2"], p["b2"]), 0.0)
    x = bn(x, p["g2"], p["be2"])
    x = lin(x, p["wc"], p["bc"])
    return x[:, :out_channels]


if __name__ == "__main__":
    batch = 8
    hidden = 32
    out_channels = 4

    key = jax.random.PRNGKey(0)
    k_h, k_p = jax.random.split(key)
    h = jax.random.normal(k_h, (batch, hidden), dtype=jnp.float32)

    raw_params = init_params(k_p, hidden, out_channels)
    padded_params = pad_params(raw_params)

    out_padded = vae_decoder(h, padded_params)
    out_padded = jax.block_until_ready(out_padded)
    out = out_padded[:, :out_channels]          # lazy slice at the consumer

    ref = _reference(h, padded_params, out_channels)
    assert out.shape == (batch, out_channels)
    assert jnp.allclose(out, ref, atol=1e-2, rtol=1e-2), "mismatch vs reference"

    print("KERNEL_OK")
</pallas_src>

<mosaic_0001>
module attributes {stable_mosaic.version = 11 : i64} {
  func.func @_vae_decoder_kernel(%arg0: memref<8x32xbf16, #tpu.memory_space<vmem>>, %arg1: memref<32x128xbf16, #tpu.memory_space<vmem>>, %arg2: memref<1x128xf32, #tpu.memory_space<vmem>>, %arg3: memref<1x128xf32, #tpu.memory_space<vmem>>, %arg4: memref<1x128xf32, #tpu.memory_space<vmem>>, %arg5: memref<128x128xbf16, #tpu.memory_space<vmem>>, %arg6: memref<1x128xf32, #tpu.memory_space<vmem>>, %arg7: memref<1x128xf32, #tpu.memory_space<vmem>>, %arg8: memref<1x128xf32, #tpu.memory_space<vmem>>, %arg9: memref<128x128xbf16, #tpu.memory_space<vmem>>, %arg10: memref<1x128xf32, #tpu.memory_space<vmem>>, %arg11: memref<8x128xf32, #tpu.memory_space<vmem>>) attributes {dimension_semantics = [], scalar_prefetch = 0 : i64, scratch_operands = 0 : i64, tpu.core_type = #tpu.core_type<tc>} {
    %c0 = arith.constant 0 : index
    %c0_0 = arith.constant 0 : index
    %0 = vector.load %arg0[%c0, %c0_0] : memref<8x32xbf16, #tpu.memory_space<vmem>>, vector<8x32xbf16>
    %c0_1 = arith.constant 0 : index
    %c0_2 = arith.constant 0 : index
    %1 = vector.load %arg1[%c0_1, %c0_2] : memref<32x128xbf16, #tpu.memory_space<vmem>>, vector<32x128xbf16>
    %cst = arith.constant dense<0.000000e+00> : vector<8x128xf32>
    %2 = tpu.matmul %0, %1, %cst {dimension_numbers = #tpu.dot_dimension_numbers<[1], [0], [0], [1], [0, 0, 1, 1], [], []>} : vector<8x32xbf16>, vector<32x128xbf16>, vector<8x128xf32> -> vector<8x128xf32>
    %c0_3 = arith.constant 0 : index
    %c0_4 = arith.constant 0 : index
    %3 = vector.load %arg2[%c0_3, %c0_4] : memref<1x128xf32, #tpu.memory_space<vmem>>, vector<1x128xf32>
    %4 = vector.broadcast %3 : vector<1x128xf32> to vector<8x128xf32>
    %5 = arith.addf %2, %4 : vector<8x128xf32>
    %cst_5 = arith.constant 0.000000e+00 : f32
    %6 = vector.broadcast %cst_5 : f32 to vector<8x128xf32>
    %7 = arith.maximumf %5, %6 : vector<8x128xf32>
    %cst_6 = arith.constant dense<0.000000e+00> : vector<128xf32>
    %8 = vector.multi_reduction <add>, %7, %cst_6 [0] : vector<8x128xf32> to vector<128xf32>
    %9 = vector.shape_cast %8 : vector<128xf32> to vector<1x128xf32>
    %cst_7 = arith.constant 1.250000e-01 : f32
    %10 = vector.broadcast %cst_7 : f32 to vector<1x128xf32>
    %11 = arith.mulf %9, %10 : vector<1x128xf32>
    %12 = vector.broadcast %11 : vector<1x128xf32> to vector<8x128xf32>
    %13 = arith.subf %7, %12 : vector<8x128xf32>
    %14 = arith.mulf %13, %13 : vector<8x128xf32>
    %cst_8 = arith.constant dense<0.000000e+00> : vector<128xf32>
    %15 = vector.multi_reduction <add>, %14, %cst_8 [0] : vector<8x128xf32> to vector<128xf32>
    %16 = vector.shape_cast %15 : vector<128xf32> to vector<1x128xf32>
    %cst_9 = arith.constant 1.250000e-01 : f32
    %17 = vector.broadcast %cst_9 : f32 to vector<1x128xf32>
    %18 = arith.mulf %16, %17 : vector<1x128xf32>
    %c0_10 = arith.constant 0 : index
    %c0_11 = arith.constant 0 : index
    %19 = vector.load %arg3[%c0_10, %c0_11] : memref<1x128xf32, #tpu.memory_space<vmem>>, vector<1x128xf32>
    %cst_12 = arith.constant 9.99999974E-6 : f32
    %20 = vector.broadcast %cst_12 : f32 to vector<1x128xf32>
    %21 = arith.addf %18, %20 : vector<1x128xf32>
    %22 = math.rsqrt %21 : vector<1x128xf32>
    %23 = arith.mulf %19, %22 : vector<1x128xf32>
    %c0_13 = arith.constant 0 : index
    %c0_14 = arith.constant 0 : index
    %24 = vector.load %arg4[%c0_13, %c0_14] : memref<1x128xf32, #tpu.memory_space<vmem>>, vector<1x128xf32>
    %25 = arith.mulf %11, %23 : vector<1x128xf32>
    %26 = arith.subf %24, %25 : vector<1x128xf32>
    %27 = vector.broadcast %23 : vector<1x128xf32> to vector<8x128xf32>
    %28 = arith.mulf %7, %27 : vector<8x128xf32>
    %29 = vector.broadcast %26 : vector<1x128xf32> to vector<8x128xf32>
    %30 = arith.addf %28, %29 : vector<8x128xf32>
    %31 = arith.truncf %30 : vector<8x128xf32> to vector<8x128xbf16>
    %c0_15 = arith.constant 0 : index
    %c0_16 = arith.constant 0 : index
    %32 = vector.load %arg5[%c0_15, %c0_16] : memref<128x128xbf16, #tpu.memory_space<vmem>>, vector<128x128xbf16>
    %cst_17 = arith.constant dense<0.000000e+00> : vector<8x128xf32>
    %33 = tpu.matmul %31, %32, %cst_17 {dimension_numbers = #tpu.dot_dimension_numbers<[1], [0], [0], [1], [0, 0, 1, 1], [], []>} : vector<8x128xbf16>, vector<128x128xbf16>, vector<8x128xf32> -> vector<8x128xf32>
    %c0_18 = arith.constant 0 : index
    %c0_19 = arith.constant 0 : index
    %34 = vector.load %arg6[%c0_18, %c0_19] : memref<1x128xf32, #tpu.memory_space<vmem>>, vector<1x128xf32>
    %35 = vector.broadcast %34 : vector<1x128xf32> to vector<8x128xf32>
    %36 = arith.addf %33, %35 : vector<8x128xf32>
    %cst_20 = arith.constant 0.000000e+00 : f32
    %37 = vector.broadcast %cst_20 : f32 to vector<8x128xf32>
    %38 = arith.maximumf %36, %37 : vector<8x128xf32>
    %cst_21 = arith.constant dense<0.000000e+00> : vector<128xf32>
    %39 = vector.multi_reduction <add>, %38, %cst_21 [0] : vector<8x128xf32> to vector<128xf32>
    %40 = vector.shape_cast %39 : vector<128xf32> to vector<1x128xf32>
    %cst_22 = arith.constant 1.250000e-01 : f32
    %41 = vector.broadcast %cst_22 : f32 to vector<1x128xf32>
    %42 = arith.mulf %40, %41 : vector<1x128xf32>
    %43 = vector.broadcast %42 : vector<1x128xf32> to vector<8x128xf32>
    %44 = arith.subf %38, %43 : vector<8x128xf32>
    %45 = arith.mulf %44, %44 : vector<8x128xf32>
    %cst_23 = arith.constant dense<0.000000e+00> : vector<128xf32>
    %46 = vector.multi_reduction <add>, %45, %cst_23 [0] : vector<8x128xf32> to vector<128xf32>
    %47 = vector.shape_cast %46 : vector<128xf32> to vector<1x128xf32>
    %cst_24 = arith.constant 1.250000e-01 : f32
    %48 = vector.broadcast %cst_24 : f32 to vector<1x128xf32>
    %49 = arith.mulf %47, %48 : vector<1x128xf32>
    %c0_25 = arith.constant 0 : index
    %c0_26 = arith.constant 0 : index
    %50 = vector.load %arg7[%c0_25, %c0_26] : memref<1x128xf32, #tpu.memory_space<vmem>>, vector<1x128xf32>
    %cst_27 = arith.constant 9.99999974E-6 : f32
    %51 = vector.broadcast %cst_27 : f32 to vector<1x128xf32>
    %52 = arith.addf %49, %51 : vector<1x128xf32>
    %53 = math.rsqrt %52 : vector<1x128xf32>
    %54 = arith.mulf %50, %53 : vector<1x128xf32>
    %c0_28 = arith.constant 0 : index
    %c0_29 = arith.constant 0 : index
    %55 = vector.load %arg8[%c0_28, %c0_29] : memref<1x128xf32, #tpu.memory_space<vmem>>, vector<1x128xf32>
    %56 = arith.mulf %42, %54 : vector<1x128xf32>
    %57 = arith.subf %55, %56 : vector<1x128xf32>
    %58 = vector.broadcast %54 : vector<1x128xf32> to vector<8x128xf32>
    %59 = arith.mulf %38, %58 : vector<8x128xf32>
    %60 = vector.broadcast %57 : vector<1x128xf32> to vector<8x128xf32>
    %61 = arith.addf %59, %60 : vector<8x128xf32>
    %62 = arith.truncf %61 : vector<8x128xf32> to vector<8x128xbf16>
    %c0_30 = arith.constant 0 : index
    %c0_31 = arith.constant 0 : index
    %63 = vector.load %arg9[%c0_30, %c0_31] : memref<128x128xbf16, #tpu.memory_space<vmem>>, vector<128x128xbf16>
    %cst_32 = arith.constant dense<0.000000e+00> : vector<8x128xf32>
    %64 = tpu.matmul %62, %63, %cst_32 {dimension_numbers = #tpu.dot_dimension_numbers<[1], [0], [0], [1], [0, 0, 1, 1], [], []>} : vector<8x128xbf16>, vector<128x128xbf16>, vector<8x128xf32> -> vector<8x128xf32>
    %c0_33 = arith.constant 0 : index
    %c0_34 = arith.constant 0 : index
    %65 = vector.load %arg10[%c0_33, %c0_34] : memref<1x128xf32, #tpu.memory_space<vmem>>, vector<1x128xf32>
    %66 = vector.broadcast %65 : vector<1x128xf32> to vector<8x128xf32>
    %67 = arith.addf %64, %66 : vector<8x128xf32>
    %c0_35 = arith.constant 0 : index
    %c0_36 = arith.constant 0 : index
    %68 = vector.load %arg11[%c0_35, %c0_36] : memref<8x128xf32, #tpu.memory_space<vmem>>, vector<8x128xf32>
    tpu.vector_store %arg11[%c0_35, %c0_36], %67 {strides = array<i32>} : memref<8x128xf32, #tpu.memory_space<vmem>>, vector<8x128xf32>,
    return
  }
}

</mosaic_0001>

<bundles_post_ra>
// kernel: vae_decoder.1
= control target key start
LH: loop header
LB: loop body
LE: loop exit
PB: predicated region body
PF: predicated region fallthrough
CT: control target
= control target key end

     0   :  { %16 = vsyncpa [#allocation3], 0  ;;  %s805_s0 = inlined_call_operand.vmem [shape: bf16[8,32], index: 0, kind: input, shape index: {}]   ;;  %s806_s1 = inlined_call_operand.vmem [shape: bf16[32,128], index: 1, kind: input, shape index: {}]   ;;  %s807_s2 = inlined_call_operand.vmem [shape: f32[1,128], index: 2, kind: input, shape index: {}]   ;;  %s808_s3 = inlined_call_operand.vmem [shape: f32[1,128], index: 3, kind: input, shape index: {}]   ;;  %s809_s4 = inlined_call_operand.vmem [shape: f32[1,128], index: 4, kind: input, shape index: {}]   ;;  %s810_s5 = inlined_call_operand.hbm [shape: bf16[128,128], index: 5, kind: input, shape index: {}]   ;;  %s811_s6 = inlined_call_operand.vmem [shape: f32[1,128], index: 6, kind: input, shape index: {}]   ;;  %s812_s7 = inlined_call_operand.vmem [shape: f32[1,128], index: 7, kind: input, shape index: {}]   ;;  %s813_s8 = inlined_call_operand.vmem [shape: f32[1,128], index: 8, kind: input, shape index: {}]   ;;  %s814_s9 = inlined_call_operand.hbm [shape: bf16[128,128], index: 9, kind: input, shape index: {}]   ;;  %s815_s10 = inlined_call_operand.vmem [shape: f32[1,128], index: 10, kind: input, shape index: {}]   ;;  %s816_s11 = inlined_call_operand.hbm [shape: f32[8,128], index: 11, kind: output, shape index: {}]  }
   0x1   :  { %17 = vsyncpa [#allocation6], 0 }
   0x2   :  { %18 = vsyncpa [#allocation4], 0  ;;  %s645_s17 = smov [#allocation2]   ;;  %s573_s21 = scalar_lea.hbm %s810_s5, 1024 }
   0x3   :  { %s34_s18 = sshll.u32 %s645_s17, 4  ;;  %p574_p0 = scmp.ne.s32.totalorder %s810_s5, %s573_s21  ;;  %s35_s18 = int_to_ptr.vmem [resolvable:$true] %s34_s18 }
   0x4   :  { %p577_p1 = scmp.lt.u32.totalorder %s573_s21, %s810_s5 }
   0x6   :  { %p579_p2 = pnand %p577_p1, %p574_p0 }
   0x8   :  { %582 = shalt.err (!%p579_p2)
}
   0x9   :  { %s583_s26 = scalar_lea.vmem %s35_s18, 1024  ;;  %p588_p4 = scmp.lt.s32.totalorder %s35_s18, %s35_s18 }
   0xa   :  { %p584_p3 = scmp.ne.s32.totalorder %s35_s18, %s583_s26  ;;  %p589_p5 = scmp.lt.s32.totalorder %s583_s26, %s583_s26 }
   0xc   :  { %p590_p6 = por %p589_p5, %p588_p4 }
   0xe   :  { %p591_p7 = pnand %p590_p6, %p584_p3 }
  0x10   :  { %594 = shalt.err (!%p591_p7)
}
  0x11   :  { %s646_s27 = smov 64   ;;  %s647_s28 = smov 4  }
  0x12   :  { %40 = dma.hbm_to_vmem [thread:$0]  %s810_s5, 1024, %s35_s18, [#allocation3], %s646_s27, %s646_s27, %s647_s28  }
  0x13   :  { %s648_s12 = smov [#allocation5]   ;;  %s595_s16 = scalar_lea.hbm %s814_s9, 1024 }
  0x14   :  { %s52_s13 = sshll.u32 %s648_s12, 4  ;;  %p596_p8 = scmp.ne.s32.totalorder %s814_s9, %s595_s16  ;;  %s53_s13 = int_to_ptr.vmem [resolvable:$true] %s52_s13 }
  0x15   :  { %p599_p9 = scmp.lt.u32.totalorder %s595_s16, %s814_s9 }
  0x17   :  { %p601_p10 = pnand %p599_p9, %p596_p8 }
  0x19   :  { %604 = shalt.err (!%p601_p10)
}
  0x1a   :  { %s605_s22 = scalar_lea.vmem %s53_s13, 1024  ;;  %p610_p12 = scmp.lt.s32.totalorder %s53_s13, %s53_s13 }
  0x1b   :  { %p606_p11 = scmp.ne.s32.totalorder %s53_s13, %s605_s22  ;;  %p611_p13 = scmp.lt.s32.totalorder %s605_s22, %s605_s22 }
  0x1d   :  { %p612_p0 = por %p611_p13, %p610_p12 }
  0x1f   :  { %p613_p1 = pnand %p612_p0, %p606_p11 }
  0x21   :  { %616 = shalt.err (!%p613_p1)
}
  0x22   :  { %58 = dma.hbm_to_vmem [thread:$0]  %s814_s9, 1024, %s53_s13, [#allocation6], %s646_s27, %s646_s27, %s647_s28  }
  0x23   :  { %639 = dma.done.wait [#allocation3], 1024  }
  0x24   :  { %640 = vsyncadd [#allocation3], 4294966272 }
  0x25   :  { %641 = dma.done.wait [#allocation6], 1024  }
  0x26   :  { %642 = vsyncadd [#allocation6], 4294966272  ;;  %v649_v0 = vmov 0.0   ;;  %vm650_vm0 = vmmov 0   ;;  %v551_v1 = vld [vmem:[%s806_s1] sm:$0xff]   ;;  %v552_v2 = vld [vmem:[%s806_s1 + $0x8] sm:$0xff]   ;;  %v161_v36 = vlaneseq }
  0x27   :  { %496 = vmatprep.subr.bf16.mxu0 %v649_v0  ;;  %500 = vmatprep.mubr.msk.bf16.mxu0 %vm650_vm0, %v649_v0  ;;  %vm92_vm1 = vcmask 261120   ;;  %v68_v3 = vld [vmem:[%s805_s0] sm:$0xf]  ;;  %v553_v4 = vld [vmem:[#allocation2] sm:$0xff]   ;;  %v555_v6 = vld [vmem:[#allocation2 + $0x10] sm:$0xff]  }
  0x28   :  { %504 = vmatprep.subr.bf16.mxu1 %v649_v0  ;;  %520 = vmatprep.mubr.msk.bf16.mxu1 %vm650_vm0, %v649_v0  ;;  %v554_v5 = vld [vmem:[#allocation2 + $0x8] sm:$0xff]   ;;  %v556_v7 = vld [vmem:[#allocation2 + $0x18] sm:$0xff]   ;;  %v557_v8 = vld [vmem:[#allocation2 + $0x20] sm:$0xff]   ;;  %v162_v37 = vshrl.u32 %v161_v36, 7 }
  0x29   :  { %497 = vmatpush3.bf16.msra.mxu0 %v551_v1  ;;  %505 = vmatpush3.bf16.msra.mxu1 %v553_v4  ;;  %v558_v9 = vld [vmem:[#allocation2 + $0x28] sm:$0xff]   ;;  %v559_v10 = vld [vmem:[#allocation2 + $0x30] sm:$0xff]   ;;  %v560_v11 = vld [vmem:[#allocation2 + $0x38] sm:$0xff]  }
  0x2a   :  { %498 = vmatprep.subr.bf16.mxu0 %v649_v0  ;;  %506 = vmatprep.subr.bf16.mxu1 %v649_v0  ;;  %v453_v12 = vld [vmem:[%s807_s2] ss:$0 sm:$0xff]  ;;  %v765_v39 = vsub.s32 0, %v162_v37  ;;  %v561_v50 = vld [vmem:[#allocation5] sm:$0xff]   ;;  %v563_v52 = vld [vmem:[#allocation5 + $0x10] sm:$0xff]  }
  0x2b   :  { %v153_v38 = vld [vmem:[%s808_s3] sm:$0x1]  ;;  %v564_v53 = vld [vmem:[#allocation5 + $0x18] sm:$0xff]   ;;  %v565_v54 = vld [vmem:[#allocation5 + $0x20] sm:$0xff]  }
  0x2c   :  { %v157_v42 = vld [vmem:[%s809_s4] sm:$0x1]  ;;  %v567_v56 = vld [vmem:[#allocation5 + $0x30] sm:$0xff]   ;;  %v568_v57 = vld [vmem:[#allocation5 + $0x38] sm:$0xff]  }
  0x2d   :  { %499 = vmatpush3.bf16.msra.mxu0 %v552_v2  ;;  %507 = vmatpush3.bf16.msra.mxu1 %v554_v5  ;;  %v562_v51 = vld [vmem:[#allocation5 + $0x8] sm:$0xff]  }
  0x2e   :  { %524 = vmatprep.subr.bf16.mxu0 %v649_v0  ;;  %508 = vmatprep.subr.bf16.mxu1 %v649_v0  ;;  %v566_v55 = vld [vmem:[#allocation5 + $0x28] sm:$0xff]  }
  0x2f   :  { %v457_v58 = vld [vmem:[%s811_s6] ss:$0 sm:$0xff] }
  0x30   :  { %501 = vmatmul.mubr.msk.bf16.vlgmr.msra.gmra.mrb[0].mxu0 %vm92_vm1, %v68_v3 }
  0x31   :  { %540 = vmatprep.mubr.msk.bf16.mxu0 %vm650_vm0, %v649_v0  ;;  %509 = vmatpush3.bf16.msra.mxu1 %v555_v6 }
  0x32   :  { %510 = vmatprep.subr.bf16.mxu1 %v649_v0  ;;  %525 = vmatpush3.bf16.msra.mxu0 %v561_v50 }
  0x33   :  { %526 = vmatprep.subr.bf16.mxu0 %v649_v0 }
  0x35   :  { %511 = vmatpush3.bf16.msra.mxu1 %v556_v7 }
  0x36   :  { %512 = vmatprep.subr.bf16.mxu1 %v649_v0  ;;  %527 = vmatpush3.bf16.msra.mxu0 %v562_v51 }
  0x37   :  { %528 = vmatprep.subr.bf16.mxu0 %v649_v0 }
  0x39   :  { %513 = vmatpush3.bf16.msra.mxu1 %v557_v8 }
  0x3a   :  { %514 = vmatprep.subr.bf16.mxu1 %v649_v0  ;;  %529 = vmatpush3.bf16.msra.mxu0 %v563_v52 }
  0x3b   :  { %530 = vmatprep.subr.bf16.mxu0 %v649_v0 }
  0x3d   :  { %515 = vmatpush3.bf16.msra.mxu1 %v558_v9 }
  0x3e   :  { %516 = vmatprep.subr.bf16.mxu1 %v649_v0  ;;  %531 = vmatpush3.bf16.msra.mxu0 %v564_v53 }
  0x3f   :  { %532 = vmatprep.subr.bf16.mxu0 %v649_v0 }
  0x41   :  { %517 = vmatpush3.bf16.msra.mxu1 %v559_v10 }
  0x42   :  { %518 = vmatprep.subr.bf16.mxu1 %v649_v0  ;;  %533 = vmatpush3.bf16.msra.mxu0 %v565_v54 }
  0x43   :  { %534 = vmatprep.subr.bf16.mxu0 %v649_v0 }
  0x45   :  { %519 = vmatpush3.bf16.msra.mxu1 %v560_v11 }
  0x46   :  { %535 = vmatpush3.bf16.msra.mxu0 %v566_v55 }
  0x47   :  { %536 = vmatprep.subr.bf16.mxu0 %v649_v0 }
  0x4a   :  { %537 = vmatpush3.bf16.msra.mxu0 %v567_v56 }
  0x4b   :  { %538 = vmatprep.subr.bf16.mxu0 %v649_v0 }
  0x4e   :  { %539 = vmatpush3.bf16.msra.mxu0 %v568_v57 }
 0x103   :  { %v130_v13 = vpop.f32.mrb[0].mxu0 }
 0x104   :  { %v131_v14 = vadd.f32 %v453_v12, %v130_v13  ;;  %v502_v15 = vpop.f32.mrb[1].mxu0 }
 0x105   :  { %v133_v16 = vpop.f32.mrb[2].mxu0 }
 0x106   :  { %v136_v17 = vmax.f32 %v131_v14, 0.0  ;;  %v503_v18 = vpop.f32.mrb[3].mxu0 }
 0x107   :  { %v303_v18 = vld [vmem:[%s812_s7] sm:$0x1]  ;;  %s651_s7 = smov [#allocation7]  }
 0x108   :  { %v137_v19 = vrot.slane %v136_v17, 4  ;;  %s443_s17 = sshll.u32 %s651_s7, 4  ;;  %s444_s17 = int_to_ptr.vmem [resolvable:$true] %s443_s17 }
 0x109   :  { %p622_p3 = scmp.lt.s32.totalorder %s444_s17, %s444_s17 }
 0x10a   :  { %v138_v20 = vadd.f32 %v137_v19, %v136_v17 }
 0x10c   :  { %v139_v21 = vrot.slane %v138_v20, 2 }
 0x10e   :  { %v140_v22 = vadd.f32 %v139_v21, %v138_v20  ;;  %v307_v21 = vld [vmem:[%s813_s8] sm:$0x1]  ;;  %s617_s8 = scalar_lea.vmem %s444_s17, 128 }
 0x10f   :  { %p618_p2 = scmp.ne.s32.totalorder %s444_s17, %s617_s8  ;;  %p623_p4 = scmp.lt.s32.totalorder %s617_s8, %s617_s8 }
 0x110   :  { %v141_v23 = vrot.slane %v140_v22, 1 }
 0x111   :  { %p624_p5 = por %p623_p4, %p622_p3 }
 0x112   :  { %v142_v24 = vadd.f32 %v141_v23, %v140_v22 }
 0x113   :  { %p625_p6 = pnand %p624_p5, %p618_p2 }
 0x114   :  { %v143_v25 = vmul.f32 0.125, %v142_v24 }
 0x116   :  { %v144_v26 = vsub.f32 %v136_v17, %v143_v25 }
 0x118   :  { %v145_v27 = vmul.f32 %v144_v26, %v144_v26 }
 0x11a   :  { %v146_v28 = vrot.slane %v145_v27, 4 }
 0x11c   :  { %v147_v29 = vadd.f32 %v146_v28, %v145_v27 }
 0x11e   :  { %v148_v30 = vrot.slane %v147_v29, 2 }
 0x120   :  { %v149_v31 = vadd.f32 %v148_v30, %v147_v29  ;;  %v466_v29 = vld [vmem:[%s815_s10] ss:$0 sm:$0xff] }
 0x122   :  { %v150_v32 = vrot.slane %v149_v31, 1 }
 0x124   :  { %v151_v33 = vadd.f32 %v150_v32, %v149_v31 }
 0x126   :  { %v152_v34 = vmul.f32 0.125, %v151_v33 }
 0x128   :  { %v154_v35 = vadd.f32 1e-05, %v152_v34 }
 0x12a   :  { %569 = vrsqrt.f32 %v154_v35 }
 0x134   :  { %v570_v40 = vpop.eup %569 }
 0x135   :  { %v156_v41 = vmul.f32 %v570_v40, %v153_v38 }
 0x137   :  { %v158_v43 = vmul.f32 %v156_v41, %v143_v25  ;;  %v164_v44 = vrot.slane %v156_v41, %v765_v39 }
 0x139   :  { %v159_v45 = vsub.f32 %v157_v42, %v158_v43  ;;  %v166_v46 = vmul.f32 %v164_v44, %v136_v17 }
 0x13b   :  { %v171_v47 = vrot.slane %v159_v45, %v765_v39 }
 0x13d   :  { %v173_v48 = vadd.f32 %v171_v47, %v166_v46 }
 0x13f   :  { %v174_v49 = vpack.c.bf16 %v173_v48, %v173_v48 }
 0x141   :  { %521 = vmatmul.mubr.bf16.vlgmr.msra.gmra.mrb[0].mxu1 %v174_v49 }
 0x214   :  { %v280_v59 = vpop.f32.mrb[0].mxu1 }
 0x215   :  { %v281_v60 = vadd.f32 %v457_v58, %v280_v59  ;;  %v522_v61 = vpop.f32.mrb[1].mxu1 }
 0x216   :  { %v283_v62 = vpop.f32.mrb[2].mxu1 }
 0x217   :  { %v286_v63 = vmax.f32 %v281_v60, 0.0  ;;  %v523_v1 = vpop.f32.mrb[3].mxu1 }
 0x219   :  { %v287_v2 = vrot.slane %v286_v63, 4 }
 0x21b   :  { %v288_v3 = vadd.f32 %v287_v2, %v286_v63 }
 0x21d   :  { %v289_v4 = vrot.slane %v288_v3, 2 }
 0x21f   :  { %v290_v5 = vadd.f32 %v289_v4, %v288_v3 }
 0x221   :  { %v291_v6 = vrot.slane %v290_v5, 1 }
 0x223   :  { %v292_v7 = vadd.f32 %v291_v6, %v290_v5 }
 0x225   :  { %v293_v8 = vmul.f32 0.125, %v292_v7 }
 0x227   :  { %v294_v9 = vsub.f32 %v286_v63, %v293_v8 }
 0x229   :  { %v295_v0 = vmul.f32 %v294_v9, %v294_v9 }
 0x22b   :  { %v296_v10 = vrot.slane %v295_v0, 4 }
 0x22d   :  { %v297_v11 = vadd.f32 %v296_v10, %v295_v0 }
 0x22f   :  { %v298_v12 = vrot.slane %v297_v11, 2 }
 0x231   :  { %v299_v13 = vadd.f32 %v298_v12, %v297_v11 }
 0x233   :  { %v300_v14 = vrot.slane %v299_v13, 1 }
 0x235   :  { %v301_v15 = vadd.f32 %v300_v14, %v299_v13 }
 0x237   :  { %v302_v16 = vmul.f32 0.125, %v301_v15 }
 0x239   :  { %v304_v17 = vadd.f32 1e-05, %v302_v16 }
 0x23b   :  { %571 = vrsqrt.f32 %v304_v17 }
 0x245   :  { %v572_v19 = vpop.eup %571 }
 0x246   :  { %v306_v20 = vmul.f32 %v572_v19, %v303_v18 }
 0x248   :  { %v308_v22 = vmul.f32 %v306_v20, %v293_v8  ;;  %v314_v23 = vrot.slane %v306_v20, %v765_v39 }
 0x24a   :  { %v309_v24 = vsub.f32 %v307_v21, %v308_v22  ;;  %v316_v25 = vmul.f32 %v314_v23, %v286_v63 }
 0x24c   :  { %v321_v26 = vrot.slane %v309_v24, %v765_v39 }
 0x24e   :  { %v323_v27 = vadd.f32 %v321_v26, %v316_v25 }
 0x250   :  { %v324_v28 = vpack.c.bf16 %v323_v27, %v323_v27 }
 0x252   :  { %541 = vmatmul.mubr.bf16.vlgmr.msra.gmra.mrb[4].mxu0 %v324_v28 }
 0x325   :  { %v430_v30 = vpop.f32.mrb[4].mxu0 }
 0x326   :  { %v431_v31 = vadd.f32 %v466_v29, %v430_v30  ;;  %v542_v32 = vpop.f32.mrb[5].mxu0 }
 0x327   :  { %v433_v33 = vpop.f32.mrb[6].mxu0 }
 0x328   :  { %436 = vst [vmem:[#allocation7] sm:$0xff] %v431_v31  ;;  %v543_v34 = vpop.f32.mrb[7].mxu0 }
 0x329   :  { %628 = shalt.err (!%p625_p6)
}
 0x32a   :  { %s629_s10 = scalar_lea.hbm %s816_s11, 128 }
 0x32b   :  { %p630_p7 = scmp.ne.s32.totalorder %s816_s11, %s629_s10  ;;  %p633_p8 = scmp.lt.u32.totalorder %s629_s10, %s816_s11 }
 0x32d   :  { %p635_p9 = pnand %p633_p8, %p630_p7 }
 0x32f   :  { %638 = shalt.err (!%p635_p9)
}
 0x330   :  { %446 = dma.vmem_to_hbm [thread:$0]  %s444_s17, 128, %s816_s11, [#allocation4]  }
 0x331   :  { %643 = dma.done.wait [#allocation4], 128  }
 0x332   :  { %644 = vsyncadd [#allocation4], 4294967168 }
 0x333   :  { %450 = vsyncpa [#allocation3], 1 }
 0x334   :  { %451 = vsyncpa [#allocation6], 1 }
 0x335   :  { %452 = vsyncpa [#allocation4], 1 }

</bundles_post_ra>
